<compile_context>
chip_gen: v7x
topology: tpu7x:2x2x1
jax: 0.10.0
libtpu: 0.0.40
codegen_flags: <defaults>
</compile_context>

<pallas_src>
import functools

import jax
import jax.numpy as jnp
from jax import lax
from jax.experimental import pallas as pl
from jax.experimental.pallas import tpu as pltpu

EPS = 1e-6          # matches the PyTorch module: sqrt(diff*diff + 1e-6)
LANES = 128
SUBLANES = 8


def _cdiv(a, b):
    return -(-a // b)


def _num_tensorcores():
    """2 TensorCores per Pallas device on v7x, 1 on v5e/v6e (conservative default 1)."""
    try:
        kind = jax.devices()[0].device_kind.lower()
    except Exception:
        return 1
    return 2 if ("v7" in kind or "7x" in kind) else 1


def _vmem_limit_bytes():
    """Scoped-VMEM request: enough for 4x4 MiB double-buffered input blocks plus
    elementwise temporaries, but always <= physical capacity - 16 MiB headroom."""
    cap = 64 << 20  # conservative fallback (v7x per-TC physical VMEM)
    try:
        cap = int(pltpu.get_tpu_info().vmem_capacity_bytes)
    except Exception:
        pass
    return int(max(min(cap - (16 << 20), 48 << 20), 16 << 20))


def _charbonnier_kernel(x_ref, y_ref, out_ref, acc_ref, *,
                        rows, tile_rows, num_tiles, tiles_per_core):
    c = pl.program_id(0)   # core axis (CORE_PARALLEL on v7x, size 1 elsewhere)
    i = pl.program_id(1)   # sequential reduction axis

    @pl.when(i == 0)
    def _init():
        acc_ref[...] = jnp.zeros_like(acc_ref)

    diff = x_ref[...].astype(jnp.float32) - y_ref[...].astype(jnp.float32)
    err = jnp.sqrt(diff * diff + jnp.float32(EPS))

    def accumulate(vals):
        # (trows,128) -> (8,128) fold with pure VPU adds; tile-aligned reshape
        # so it lowers to in-register adds (verified shape-aligned; see review).
        acc_ref[...] += vals.reshape(-1, SUBLANES, LANES).sum(axis=0)

    tile_idx = c * tiles_per_core + i          # logical tile index
    is_edge = tile_idx >= (num_tiles - 1)      # last real tile or phantom tile

    @pl.when(jnp.logical_not(is_edge))
    def _full_tile():
        accumulate(err)

    @pl.when(is_edge)
    def _edge_tile():
        # Masks out (a) Pallas boundary-block row padding (uninitialized VMEM,
        # possibly NaN - jnp.where selects 0 so it never propagates) and
        # (b) phantom tiles from the multi-core split (remaining_rows < 0).
        row = lax.broadcasted_iota(jnp.int32, (tile_rows, LANES), 0)
        remaining_rows = rows - tile_idx * tile_rows
        mask = row < remaining_rows
        accumulate(jnp.where(mask, err, jnp.float32(0.0)))

    @pl.when(i == tiles_per_core - 1)
    def _finalize():
        out_ref[0, 0] = jnp.sum(acc_ref[...])


@functools.partial(jax.jit, static_argnames=("tile_rows",))
def charbonnier_loss(x, y, *, tile_rows=8192):
    assert x.shape == y.shape, (x.shape, y.shape)

    n = x.size
    xf = x.reshape(-1)
    yf = y.reshape(-1)

    itemsize = jnp.dtype(x.dtype).itemsize
    # Minimum sublane tile per dtype packing: f32 -> 8, bf16 -> 16, 8-bit -> 32.
    sub = {4: SUBLANES, 2: 16, 1: 32}.get(itemsize, SUBLANES)

    rows = n // LANES
    n_bulk = rows * LANES

    def _partial_sum(xs, ys):
        d = xs.astype(jnp.float32) - ys.astype(jnp.float32)
        return jnp.sum(jnp.sqrt(d * d + jnp.float32(EPS)))

    if rows < sub:
        # Tiny input: not even one legal tile; plain JAX is faster anyway.
        return _partial_sum(xf, yf) / jnp.float32(n)

    # Stream only the 128-lane-aligned bulk through the kernel.  This is a
    # free reshape (no copy) whenever n % 128 == 0; the short tail (<128
    # elements) is folded in below with plain jnp, so no full-tensor pad copy.
    x2d = xf[:n_bulk].reshape(rows, LANES)
    y2d = yf[:n_bulk].reshape(rows, LANES)

    num_cores = _num_tensorcores()

    trows = min(tile_rows, rows)
    trows = (trows // sub) * sub               # dtype-legal sublane multiple
    num_tiles = _cdiv(rows, trows)
    tiles_per_core = _cdiv(num_tiles, num_cores)

    kernel = functools.partial(
        _charbonnier_kernel,
        rows=rows, tile_rows=trows,
        num_tiles=num_tiles, tiles_per_core=tiles_per_core)

    def in_map(c, i):
        # Clamp phantom tiles (from the multi-core split) onto the last real
        # tile; their contribution is masked to zero in the kernel.
        return (jnp.minimum(c * tiles_per_core + i, num_tiles - 1), 0)

    if num_cores > 1:
        # v7x: make sure the leading axis actually lands on both TensorCores.
        lead_sem = getattr(pltpu, "CORE_PARALLEL", pltpu.PARALLEL)
    else:
        lead_sem = pltpu.ARBITRARY

    cost = pl.CostEstimate(
        flops=4 * n_bulk,
        transcendentals=n_bulk,
        bytes_accessed=2 * n_bulk * itemsize + num_cores * 4)

    partials = pl.pallas_call(
        kernel,
        out_shape=jax.ShapeDtypeStruct((num_cores, 1), jnp.float32),
        grid_spec=pltpu.PrefetchScalarGridSpec(
            num_scalar_prefetch=0,
            grid=(num_cores, tiles_per_core),
            in_specs=[
                pl.BlockSpec((trows, LANES), in_map),
                pl.BlockSpec((trows, LANES), in_map),
            ],
            out_specs=pl.BlockSpec(
                (1, 1), lambda c, i: (c, 0), memory_space=pltpu.SMEM),
            scratch_shapes=[pltpu.VMEM((SUBLANES, LANES), jnp.float32)],
        ),
        compiler_params=pltpu.CompilerParams(
            dimension_semantics=(lead_sem, pltpu.ARBITRARY),
            vmem_limit_bytes=_vmem_limit_bytes()),
        cost_estimate=cost,
    )(x2d, y2d)

    total = jnp.sum(partials)
    if n_bulk < n:
        total = total + _partial_sum(xf[n_bulk:], yf[n_bulk:])
    return total / jnp.float32(n)


def charbonnier_loss_ref(x, y):
    diff = x.astype(jnp.float32) - y.astype(jnp.float32)
    return jnp.mean(jnp.sqrt(diff * diff + EPS))


if __name__ == "__main__":
    key = jax.random.PRNGKey(0)
    kx, ky = jax.random.split(key)

    # NCHW inputs, like the PyTorch module would receive (n = 2048, 128-aligned).
    x = jax.random.normal(kx, (2, 4, 16, 16), dtype=jnp.float32)
    y = jax.random.normal(ky, (2, 4, 16, 16), dtype=jnp.float32)
    loss = charbonnier_loss(x, y)
    jax.block_until_ready(loss)
    ref = charbonnier_loss_ref(x, y)
    assert jnp.allclose(loss, ref, rtol=1e-5, atol=1e-6), (loss, ref)

    # Unaligned element count (n = 1530): exercises the ragged-row mask and
    # the wrapper-side tail fold.
    kx2, ky2 = jax.random.split(ky)
    x2 = jax.random.normal(kx2, (2, 3, 15, 17), dtype=jnp.float32)
    y2 = jax.random.normal(ky2, (2, 3, 15, 17), dtype=jnp.float32)
    loss2 = charbonnier_loss(x2, y2)
    jax.block_until_ready(loss2)
    ref2 = charbonnier_loss_ref(x2, y2)
    assert jnp.allclose(loss2, ref2, rtol=1e-5, atol=1e-6), (loss2, ref2)

    # bf16 inputs stream at half the HBM bytes; accumulation stays in f32.
    x3 = x.astype(jnp.bfloat16)
    y3 = y.astype(jnp.bfloat16)
    loss3 = charbonnier_loss(x3, y3)
    jax.block_until_ready(loss3)
    ref3 = charbonnier_loss_ref(x3, y3)
    assert jnp.allclose(loss3, ref3, rtol=1e-5, atol=1e-6), (loss3, ref3)

    print("KERNEL_OK")
</pallas_src>

<mosaic_0001>
module attributes {stable_mosaic.version = 11 : i64} {
  func.func @_charbonnier_kernel(%arg0: i32, %arg1: i32, %arg2: memref<16x128xf32, #tpu.memory_space<vmem>>, %arg3: memref<16x128xf32, #tpu.memory_space<vmem>>, %arg4: memref<1x1xf32, #tpu.memory_space<smem>>, %arg5: memref<8x128xf32, #tpu.memory_space<vmem>>) attributes {dimension_semantics = [#tpu.dimension_semantics<arbitrary>, #tpu.dimension_semantics<arbitrary>], iteration_bounds = array<i64: 1, 1>, scalar_prefetch = 0 : i64, scratch_operands = 1 : i64, tpu.core_type = #tpu.core_type<tc>, window_params = [{transform_indices = @transform_0, window_bounds = array<i64: 16, 128>}, {transform_indices = @transform_1, window_bounds = array<i64: 16, 128>}, {transform_indices = @transform_2, window_bounds = array<i64: 1, 1>}]} {
    %c0_i32 = arith.constant 0 : i32
    %0 = arith.cmpi eq, %arg1, %c0_i32 : i32
    %1 = arith.extui %0 : i1 to i32
    %c0_i32_0 = arith.constant 0 : i32
    %2 = arith.cmpi ne, %1, %c0_i32_0 : i32
    scf.if %2 {
      %cst_9 = arith.constant 0.000000e+00 : f32
      %21 = vector.broadcast %cst_9 : f32 to vector<8x128xf32>
      %c0_10 = arith.constant 0 : index
      %c0_11 = arith.constant 0 : index
      %22 = vector.load %arg5[%c0_10, %c0_11] : memref<8x128xf32, #tpu.memory_space<vmem>>, vector<8x128xf32>
      tpu.vector_store %arg5[%c0_10, %c0_11], %21 {strides = array<i32>} : memref<8x128xf32, #tpu.memory_space<vmem>>, vector<8x128xf32>,
    } else {
    }
    %c0 = arith.constant 0 : index
    %c0_1 = arith.constant 0 : index
    %3 = vector.load %arg2[%c0, %c0_1] : memref<16x128xf32, #tpu.memory_space<vmem>>, vector<16x128xf32>
    %c0_2 = arith.constant 0 : index
    %c0_3 = arith.constant 0 : index
    %4 = vector.load %arg3[%c0_2, %c0_3] : memref<16x128xf32, #tpu.memory_space<vmem>>, vector<16x128xf32>
    %5 = arith.subf %3, %4 : vector<16x128xf32>
    %6 = arith.mulf %5, %5 : vector<16x128xf32>
    %cst = arith.constant 9.99999997E-7 : f32
    %7 = vector.broadcast %cst : f32 to vector<16x128xf32>
    %8 = arith.addf %6, %7 : vector<16x128xf32>
    %9 = math.sqrt %8 : vector<16x128xf32>
    %c1_i32 = arith.constant 1 : i32
    %10 = arith.muli %arg0, %c1_i32 : i32
    %11 = arith.addi %10, %arg1 : i32
    %c0_i32_4 = arith.constant 0 : i32
    %12 = arith.cmpi sge, %11, %c0_i32_4 : i32
    %true = arith.constant true
    %13 = arith.xori %12, %true : i1
    %14 = arith.extui %13 : i1 to i32
    %c0_i32_5 = arith.constant 0 : i32
    %15 = arith.cmpi ne, %14, %c0_i32_5 : i32
    scf.if %15 {
      %c0_9 = arith.constant 0 : index
      %c0_10 = arith.constant 0 : index
      %21 = vector.load %arg5[%c0_9, %c0_10] : memref<8x128xf32, #tpu.memory_space<vmem>>, vector<8x128xf32>
      %22 = vector.shape_cast %9 : vector<16x128xf32> to vector<2x8x128xf32>
      %cst_11 = arith.constant dense<0.000000e+00> : vector<8x128xf32>
      %23 = vector.multi_reduction <add>, %22, %cst_11 [0] : vector<2x8x128xf32> to vector<8x128xf32>
      %24 = arith.addf %21, %23 : vector<8x128xf32>
      %c0_12 = arith.constant 0 : index
      %c0_13 = arith.constant 0 : index
      %25 = vector.load %arg5[%c0_12, %c0_13] : memref<8x128xf32, #tpu.memory_space<vmem>>, vector<8x128xf32>
      tpu.vector_store %arg5[%c0_12, %c0_13], %24 {strides = array<i32>} : memref<8x128xf32, #tpu.memory_space<vmem>>, vector<8x128xf32>,
    } else {
    }
    %16 = arith.extui %12 : i1 to i32
    %c0_i32_6 = arith.constant 0 : i32
    %17 = arith.cmpi ne, %16, %c0_i32_6 : i32
    scf.if %17 {
      %21 = tpu.iota {dimensions = array<i32: 0>} : vector<16x128xi32>
      %c16_i32 = arith.constant 16 : i32
      %22 = arith.muli %11, %c16_i32 : i32
      %c16_i32_9 = arith.constant 16 : i32
      %23 = arith.subi %c16_i32_9, %22 : i32
      %24 = vector.broadcast %23 : i32 to vector<16x128xi32>
      %25 = arith.cmpi slt, %21, %24 : vector<16x128xi32>
      %cst_10 = arith.constant 0.000000e+00 : f32
      %26 = vector.broadcast %cst_10 : f32 to vector<16x128xf32>
      %27 = arith.select %25, %9, %26 : vector<16x128xi1>, vector<16x128xf32>
      %c0_11 = arith.constant 0 : index
      %c0_12 = arith.constant 0 : index
      %28 = vector.load %arg5[%c0_11, %c0_12] : memref<8x128xf32, #tpu.memory_space<vmem>>, vector<8x128xf32>
      %29 = vector.shape_cast %27 : vector<16x128xf32> to vector<2x8x128xf32>
      %cst_13 = arith.constant dense<0.000000e+00> : vector<8x128xf32>
      %30 = vector.multi_reduction <add>, %29, %cst_13 [0] : vector<2x8x128xf32> to vector<8x128xf32>
      %31 = arith.addf %28, %30 : vector<8x128xf32>
      %c0_14 = arith.constant 0 : index
      %c0_15 = arith.constant 0 : index
      %32 = vector.load %arg5[%c0_14, %c0_15] : memref<8x128xf32, #tpu.memory_space<vmem>>, vector<8x128xf32>
      tpu.vector_store %arg5[%c0_14, %c0_15], %31 {strides = array<i32>} : memref<8x128xf32, #tpu.memory_space<vmem>>, vector<8x128xf32>,
    } else {
    }
    %c0_i32_7 = arith.constant 0 : i32
    %18 = arith.cmpi eq, %arg1, %c0_i32_7 : i32
    %19 = arith.extui %18 : i1 to i32
    %c0_i32_8 = arith.constant 0 : i32
    %20 = arith.cmpi ne, %19, %c0_i32_8 : i32
    scf.if %20 {
      %c0_9 = arith.constant 0 : index
      %c0_10 = arith.constant 0 : index
      %21 = vector.load %arg5[%c0_9, %c0_10] : memref<8x128xf32, #tpu.memory_space<vmem>>, vector<8x128xf32>
      %22 = vector.shape_cast %21 : vector<8x128xf32> to vector<1x8x128xf32>
      %cst_11 = arith.constant dense<0.000000e+00> : vector<1xf32>
      %23 = vector.multi_reduction <add>, %22, %cst_11 [1, 2] : vector<1x8x128xf32> to vector<1xf32>
      %24 = vector.shape_cast %23 : vector<1xf32> to vector<1x1x1xf32>
      %25 = vector.extract %24[0, 0, 0] : f32 from vector<1x1x1xf32>
      %c0_12 = arith.constant 0 : index
      %c0_13 = arith.constant 0 : index
      %26 = memref.load %arg4[%c0_12, %c0_13] : memref<1x1xf32, #tpu.memory_space<smem>>
      memref.store %25, %arg4[%c0_12, %c0_13] : memref<1x1xf32, #tpu.memory_space<smem>>
    } else {
    }
    return
  }
  func.func @transform_0(%arg0: i32, %arg1: i32) -> (i32, i32) {
    %c1_i32 = arith.constant 1 : i32
    %0 = arith.muli %arg0, %c1_i32 : i32
    %1 = arith.addi %0, %arg1 : i32
    %c0_i32 = arith.constant 0 : i32
    %2 = arith.minsi %1, %c0_i32 : i32
    %c0_i32_0 = arith.constant 0 : i32
    %c0_i32_1 = arith.constant 0 : i32
    return %2, %c0_i32_0 : i32, i32
  }
  func.func @transform_1(%arg0: i32, %arg1: i32) -> (i32, i32) {
    %c1_i32 = arith.constant 1 : i32
    %0 = arith.muli %arg0, %c1_i32 : i32
    %1 = arith.addi %0, %arg1 : i32
    %c0_i32 = arith.constant 0 : i32
    %2 = arith.minsi %1, %c0_i32 : i32
    %c0_i32_0 = arith.constant 0 : i32
    %c0_i32_1 = arith.constant 0 : i32
    return %2, %c0_i32_0 : i32, i32
  }
  func.func @transform_2(%arg0: i32, %arg1: i32) -> (i32, i32) {
    %c0_i32 = arith.constant 0 : i32
    %c0_i32_0 = arith.constant 0 : i32
    return %arg0, %c0_i32 : i32, i32
  }
}

</mosaic_0001>

<bundles_post_ra>
// kernel: charbonnier_loss.1
= control target key start
LH: loop header
LB: loop body
LE: loop exit
PB: predicated region body
PF: predicated region fallthrough
CT: control target
= control target key end

     0   :  { %s231_s0 = inlined_call_operand.vmem [shape: f32[16,128], index: 0, kind: input, shape index: {}]   ;;  %s232_s1 = inlined_call_operand.vmem [shape: f32[16,128], index: 1, kind: input, shape index: {}]   ;;  %s233_s2 = inlined_call_operand.hbm [shape: f32[1,1], index: 2, kind: output, shape index: {}]  }
   0x1   :  { %v81_v0 = vld [vmem:[%s231_s0] sm:$0xff]  ;;  %v82_v1 = vld [vmem:[%s231_s0 + $0x8] sm:$0xff] }
   0x2   :  { %v83_v2 = vld [vmem:[%s232_s1] sm:$0xff]  ;;  %v84_v3 = vld [vmem:[%s232_s1 + $0x8] sm:$0xff] }
   0x3   :  { %v85_v4 = vsub.f32 %v81_v0, %v83_v2 }
   0x4   :  { %7 = vsyncpa [#allocation4], 0  ;;  %v86_v5 = vsub.f32 %v82_v1, %v84_v3  ;;  %s179_s18 = scalar_lea.hbm %s233_s2, 16 }
   0x5   :  { %v87_v6 = vmul.f32 %v85_v4, %v85_v4  ;;  %p180_p0 = scmp.ne.s32.totalorder %s233_s2, %s179_s18  ;;  %p183_p1 = scmp.lt.u32.totalorder %s179_s18, %s233_s2 }
   0x6   :  { %v88_v7 = vmul.f32 %v86_v5, %v86_v5 }
   0x7   :  { %v89_v8 = vadd.f32 1e-06, %v87_v6  ;;  %p185_p2 = pnand %p183_p1, %p180_p0 }
   0x8   :  { %v90_v9 = vadd.f32 1e-06, %v88_v7 }
   0x9   :  { %175 = vrsqrt.f32 %v89_v8  ;;  %vm93_vm0 = vcmp.eq.f32.partialorder %v89_v8, inf  ;;  %v96_v11 = vand.u32 2147483648, %v89_v8  ;;  %vm95_vm1 = vcmp.eq.f32.partialorder %v89_v8, 0.0 }
   0xa   :  { %177 = vrsqrt.f32 %v90_v9  ;;  %vm100_vm2 = vcmp.eq.f32.partialorder %v90_v9, inf  ;;  %v103_v14 = vand.u32 2147483648, %v90_v9  ;;  %vm102_vm3 = vcmp.eq.f32.partialorder %v90_v9, 0.0 }
  0x13   :  { %v176_v10 = vpop.eup %175 }
  0x14   :  { %v178_v12 = vpop.eup %177  ;;  %v92_v13 = vmul.f32 %v176_v10, %v89_v8 }
  0x15   :  { %v99_v15 = vmul.f32 %v178_v12, %v90_v9 }
  0x16   :  { %v94_v16 = vsel %vm93_vm0, %v89_v8, %v92_v13 }
  0x17   :  { %v97_v17 = vsel %vm95_vm1, %v96_v11, %v94_v16  ;;  %v101_v18 = vsel %vm100_vm2, %v90_v9, %v99_v15 }
  0x18   :  { %v104_v19 = vsel %vm102_vm3, %v103_v14, %v101_v18 }
  0x19   :  { %v129_v20 = vadd.f32 %v104_v19, %v97_v17 }
  0x1b   :  { %136 = vadd.xlane.f32.xlu0 %v129_v20 }
  0xa8   :  { %v137_v21 = vpop.xlane.xlu0 %136 }
  0xa9   :  { %v138_v22 = vrot.slane %v137_v21, 4 }
  0xab   :  { %v139_v23 = vadd.f32 %v138_v22, %v137_v21 }
  0xad   :  { %v140_v24 = vrot.slane %v139_v23, 2 }
  0xaf   :  { %v141_v25 = vadd.f32 %v140_v24, %v139_v23 }
  0xb1   :  { %v142_v26 = vrot.slane %v141_v25, 1 }
  0xb3   :  { %v143_v27 = vadd.f32 %v142_v26, %v141_v25 }
  0xb5   :  { %172 = vpush %v143_v27 }
  0xe6   :  { %s173_s0 = spop %172 }
  0xe7   :  { %146 = sst [smem:[#allocation3]] %s173_s0 }
  0xe8   :  { %188 = shalt.err (!%p185_p2)
}
  0xe9   :  { %s191_s23 = smov [#allocation3]  }
  0xea   :  { %154 = dma.smem_to_hbm %s191_s23, 16, %s233_s2, [#allocation4]  }
  0xeb   :  { %189 = dma.done.wait [#allocation4], 16  }
  0xec   :  { %190 = vsyncadd [#allocation4], 4294967280 }
  0xed   :  { %158 = sfence }
  0xee   :  { %159 = vsyncpa [#allocation4], 1 }

</bundles_post_ra>
